<compile_context>
chip_gen: v5e
topology: v5e:2x2
jax: 0.10.0
libtpu: 0.0.40
codegen_flags: <defaults>
</compile_context>

<pallas_src>
import functools

import jax
import jax.numpy as jnp
import numpy as np
from jax.experimental import pallas as pl
from jax.experimental.pallas import tpu as pltpu

# Fits comfortably under v7x's 64 MiB/TC VMEM as well as v5e/v6e's 128 MiB.
VMEM_LIMIT = 48 * 1024 * 1024


# ---------------------------------------------------------------------------
# Pallas kernels
# ---------------------------------------------------------------------------
def _mm_bn_kernel(a_ref, w_ref, s_ref, b_ref, *rest, relu, has_res):
    """K-tiled matmul + folded BN (+ residual) (+ ReLU).

    grid = (M-tiles, N-tiles, K-tiles); K innermost ("arbitrary").
    Accumulates in an f32 VMEM scratch, finalizes on the last K step.
    """
    if has_res:
        r_ref, o_ref, acc_ref = rest
    else:
        r_ref = None
        o_ref, acc_ref = rest
    k = pl.program_id(2)

    @pl.when(k == 0)
    def _init():
        acc_ref[...] = jnp.zeros_like(acc_ref)

    acc_ref[...] += jnp.dot(a_ref[...], w_ref[...],
                            preferred_element_type=jnp.float32)

    @pl.when(k == pl.num_programs(2) - 1)
    def _finalize():
        y = acc_ref[...] * s_ref[...] + b_ref[...]
        if has_res:
            y = y + r_ref[...].astype(jnp.float32)
        if relu:
            y = jnp.maximum(y, 0.0)
        o_ref[...] = y.astype(o_ref.dtype)


def _conv3x3_kernel(x0_ref, x1_ref, x2_ref, w_ref, s_ref, b_ref, o_ref, *,
                    wo, relu):
    """Direct 3x3 / stride-1 conv row kernel (no im2col materialization).

    x0/x1/x2 are the same padded NHWC tensor indexed at output rows h, h+1,
    h+2 via BlockSpec index maps; the three column taps are static shifted
    slices of each row.  The 9 tap matmuls accumulate in f32; BN+ReLU fused.
    """
    acc = None
    for di, xr in enumerate((x0_ref, x1_ref, x2_ref)):
        for dj in range(3):
            a = xr[0, 0, dj:dj + wo, :]                      # (Wo, Cin) bf16
            p = jnp.dot(a, w_ref[3 * di + dj],
                        preferred_element_type=jnp.float32)   # (Wo, tn) f32
            acc = p if acc is None else acc + p
    y = acc * s_ref[...] + b_ref[...]
    if relu:
        y = jnp.maximum(y, 0.0)
    o_ref[0, 0] = y.astype(o_ref.dtype)


def _maxpool_rows_kernel(r0_ref, r1_ref, r2_ref, o_ref):
    # Incremental max over the three vertical taps of one output row block.
    o_ref[...] = jnp.maximum(jnp.maximum(r0_ref[...], r1_ref[...]),
                             r2_ref[...])


def _avgpool_kernel(x_ref, o_ref):
    # x_ref: [B, H*W, tc] -> mean over the spatial axis in f32.
    o_ref[...] = jnp.mean(x_ref[...].astype(jnp.float32), axis=1)


# ---------------------------------------------------------------------------
# Helpers
# ---------------------------------------------------------------------------
def _round_up(x, m):
    return ((x + m - 1) // m) * m


def _pick_tile(n, candidates):
    for t in candidates:
        if n % t == 0:
            return t
    return n  # fall back to a full-dim block (always legal)


# ---------------------------------------------------------------------------
# Fused conv(as matmul) + BN + (residual) + (ReLU)
# ---------------------------------------------------------------------------
def fused_matmul_bn(a, w, scale, shift, residual=None, relu=True):
    """a: [M, K], w: [K, N] (bf16), scale/shift: [N] f32, residual: [M, N]."""
    M, K = a.shape
    N = w.shape[1]

    # Only conv1's im2col K (7*7*3 = 147) is ragged; every other K in the
    # network is a multiple of 128 (or <= 128 and used as a full-dim block).
    if K > 128 and K % 128 != 0:
        Kp = _round_up(K, 128)
        a = jnp.pad(a, ((0, 0), (0, Kp - K)))
        w = jnp.pad(w, ((0, Kp - K), (0, 0)))
        K = Kp

    a = a.astype(jnp.bfloat16)
    w = w.astype(jnp.bfloat16)
    s2 = scale.reshape(1, N).astype(jnp.float32)
    b2 = shift.reshape(1, N).astype(jnp.float32)

    tm = _pick_tile(M, (512, 256, 128, 64, 32, 16, 8))
    tn = _pick_tile(N, (256, 128))
    tk = _pick_tile(K, (512, 384, 256, 128))
    gm, gn, gk = M // tm, N // tn, K // tk

    in_specs = [
        pl.BlockSpec((tm, tk), lambda i, j, k: (i, k)),
        pl.BlockSpec((tk, tn), lambda i, j, k: (k, j)),
        pl.BlockSpec((1, tn), lambda i, j, k: (0, j)),
        pl.BlockSpec((1, tn), lambda i, j, k: (0, j)),
    ]
    args = [a, w, s2, b2]
    has_res = residual is not None
    if has_res:
        in_specs.append(pl.BlockSpec((tm, tn), lambda i, j, k: (i, j)))
        args.append(residual.astype(jnp.bfloat16))

    flops = 2 * M * K * N
    bytes_accessed = 2 * (M * K + K * N + M * N) + (2 * M * N if has_res else 0)

    out = pl.pallas_call(
        functools.partial(_mm_bn_kernel, relu=relu, has_res=has_res),
        out_shape=jax.ShapeDtypeStruct((M, N), jnp.bfloat16),
        grid=(gm, gn, gk),
        in_specs=in_specs,
        out_specs=pl.BlockSpec((tm, tn), lambda i, j, k: (i, j)),
        scratch_shapes=[pltpu.VMEM((tm, tn), jnp.float32)],
        compiler_params=pltpu.CompilerParams(
            dimension_semantics=("parallel", "parallel", "arbitrary"),
            vmem_limit_bytes=VMEM_LIMIT),
        cost_estimate=pl.CostEstimate(flops=flops, transcendentals=0,
                                      bytes_accessed=bytes_accessed),
    )(*args)
    return out


def conv3x3_direct(x, w, bn, *, relu=True):
    """3x3 / stride-1 / pad-1 conv + BN + ReLU without im2col. NHWC in/out."""
    B, H, W_, Cin = x.shape
    Cout = w.shape[3]
    Ho, Wo = H, W_
    Wp = W_ + 2
    xp = jnp.pad(x, ((0, 0), (1, 1), (1, 1), (0, 0)))
    wt = w.reshape(9, Cin, Cout).astype(jnp.bfloat16)
    s2 = bn[0].reshape(1, Cout).astype(jnp.float32)
    b2 = bn[1].reshape(1, Cout).astype(jnp.float32)

    tn = _pick_tile(Cout, (256, 128))
    gn = Cout // tn

    # The same padded tensor, indexed at output rows h, h+1, h+2.
    x_specs = [
        pl.BlockSpec((1, 1, Wp, Cin), (lambda j, b, h, d=d: (b, h + d, 0, 0)))
        for d in range(3)
    ]
    flops = 2 * B * Ho * Wo * 9 * Cin * Cout
    bytes_accessed = 2 * (3 * xp.size + wt.size + B * Ho * Wo * Cout)

    out = pl.pallas_call(
        functools.partial(_conv3x3_kernel, wo=Wo, relu=relu),
        out_shape=jax.ShapeDtypeStruct((B, Ho, Wo, Cout), jnp.bfloat16),
        grid=(gn, B, Ho),
        in_specs=x_specs + [
            pl.BlockSpec((9, Cin, tn), lambda j, b, h: (0, 0, j)),
            pl.BlockSpec((1, tn), lambda j, b, h: (0, j)),
            pl.BlockSpec((1, tn), lambda j, b, h: (0, j)),
        ],
        out_specs=pl.BlockSpec((1, 1, Wo, tn), lambda j, b, h: (b, h, 0, j)),
        compiler_params=pltpu.CompilerParams(
            dimension_semantics=("parallel", "parallel", "parallel"),
            vmem_limit_bytes=VMEM_LIMIT),
        cost_estimate=pl.CostEstimate(flops=flops, transcendentals=0,
                                      bytes_accessed=bytes_accessed),
    )(xp, xp, xp, wt, s2, b2)
    return out


def _im2col(x, kh, kw, stride, padding):
    """Generic patch extraction (only conv1 7x7/s2 and the three 3x3/s2)."""
    B, H, W_, C = x.shape
    Ho = (H + 2 * padding - kh) // stride + 1
    Wo = (W_ + 2 * padding - kw) // stride + 1
    xp = jnp.pad(x, ((0, 0), (padding, padding), (padding, padding), (0, 0)))
    cols = []
    for i in range(kh):
        for j in range(kw):
            cols.append(
                xp[:, i:i + (Ho - 1) * stride + 1:stride,
                   j:j + (Wo - 1) * stride + 1:stride, :])
    patches = jnp.concatenate(cols, axis=-1)        # [B, Ho, Wo, kh*kw*C]
    return patches.reshape(B * Ho * Wo, kh * kw * C), Ho, Wo


def conv_bn(x, w, bn, *, stride, padding, relu=True, residual=None):
    """x: [B,H,W,Cin] NHWC bf16, w: [kh,kw,Cin,Cout] bf16, bn=(scale, shift)."""
    kh, kw, Cin, Cout = w.shape
    B = x.shape[0]

    if kh == 1 and kw == 1:
        if stride > 1:
            # A 1x1/s2 conv only needs every other row/column.
            x = x[:, ::stride, ::stride, :]
        _, Ho, Wo, _ = x.shape
        a = x.reshape(B * Ho * Wo, Cin)
        r = None if residual is None else residual.reshape(B * Ho * Wo, Cout)
        out = fused_matmul_bn(a, w.reshape(Cin, Cout), bn[0], bn[1],
                              residual=r, relu=relu)
        return out.reshape(B, Ho, Wo, Cout)

    if kh == 3 and kw == 3 and stride == 1 and padding == 1 and residual is None:
        return conv3x3_direct(x, w, bn, relu=relu)

    # Fallback: im2col + fused matmul (conv1 and the three 3x3/s2 convs).
    a, Ho, Wo = _im2col(x, kh, kw, stride, padding)
    r = None if residual is None else residual.reshape(B * Ho * Wo, Cout)
    out = fused_matmul_bn(a, w.reshape(kh * kw * Cin, Cout), bn[0], bn[1],
                          residual=r, relu=relu)
    return out.reshape(B, Ho, Wo, Cout)


def maxpool_3x3_s2(x):
    """PyTorch MaxPool2d(kernel_size=3, stride=2, padding=1) on NHWC."""
    B, H, W_, C = x.shape
    Ho = (H + 2 - 3) // 2 + 1
    Wo = (W_ + 2 - 3) // 2 + 1
    xp = jnp.pad(x, ((0, 0), (1, 1), (1, 1), (0, 0)),
                 constant_values=-jnp.inf)
    # W-direction taps in one fused XLA elementwise pass (no 9-tap HBM stack).
    # TODO(synk): the W-direction max stays in XLA glue; the H-direction
    # reduction below is the tiled Pallas kernel.
    m = jnp.maximum(
        jnp.maximum(xp[:, :, 0:2 * Wo:2, :], xp[:, :, 1:2 * Wo:2, :]),
        xp[:, :, 2:2 * Wo + 1:2, :])                 # [B, H+2, Wo, C]
    specs = [
        pl.BlockSpec((B, 1, Wo, C), (lambda h, d=d: (0, 2 * h + d, 0, 0)))
        for d in range(3)
    ]
    out = pl.pallas_call(
        _maxpool_rows_kernel,
        out_shape=jax.ShapeDtypeStruct((B, Ho, Wo, C), x.dtype),
        grid=(Ho,),
        in_specs=specs,
        out_specs=pl.BlockSpec((B, 1, Wo, C), lambda h: (0, h, 0, 0)),
        compiler_params=pltpu.CompilerParams(
            dimension_semantics=("parallel",),
            vmem_limit_bytes=VMEM_LIMIT),
    )(m, m, m)
    return out


def global_avgpool(x):
    """AdaptiveAvgPool2d((1,1)) + flatten on NHWC -> [B, C] (f32)."""
    B, H, W_, C = x.shape
    xr = x.reshape(B, H * W_, C)
    tc = _pick_tile(C, (256, 128))
    return pl.pallas_call(
        _avgpool_kernel,
        out_shape=jax.ShapeDtypeStruct((B, C), jnp.float32),
        grid=(C // tc,),
        in_specs=[pl.BlockSpec((B, H * W_, tc), lambda j: (0, 0, j))],
        out_specs=pl.BlockSpec((B, tc), lambda j: (0, j)),
        compiler_params=pltpu.CompilerParams(
            dimension_semantics=("parallel",),
            vmem_limit_bytes=VMEM_LIMIT),
    )(xr)


# ---------------------------------------------------------------------------
# Deterministic synthetic parameters (ResNet-101 shapes)
# ---------------------------------------------------------------------------
def make_conv(key, kh, kw, cin, cout):
    fan_in = kh * kw * cin
    w = jax.random.normal(key, (kh, kw, cin, cout), jnp.float32) / np.sqrt(fan_in)
    return w.astype(jnp.bfloat16)


def make_bn(key, c, eps=1e-5):
    k1, k2 = jax.random.split(key)
    gamma = jax.random.uniform(k1, (c,), jnp.float32, 0.8, 1.2)
    beta = jax.random.uniform(k2, (c,), jnp.float32, -0.1, 0.1)
    mean = jnp.zeros((c,), jnp.float32)
    var = jnp.ones((c,), jnp.float32)
    scale = gamma / jnp.sqrt(var + eps)       # BN folded to per-channel affine
    shift = beta - mean * scale
    return scale, shift


def build_params(key):
    keys = jax.random.split(key, 512)
    it = iter(range(512))
    nk = lambda: keys[next(it)]

    params = {
        "conv1": make_conv(nk(), 7, 7, 3, 64),
        "bn1": make_bn(nk(), 64),
        "layers": [],
    }
    inplanes = 64
    # ResNet-101: (planes, num_blocks, stride), Bottleneck expansion 4
    for planes, num_blocks, stride in [(64, 3, 1), (128, 4, 2),
                                       (256, 23, 2), (512, 3, 2)]:
        blocks = []
        for b in range(num_blocks):
            s = stride if b == 0 else 1
            blk = {"stride": s}
            blk["conv1_w"] = make_conv(nk(), 1, 1, inplanes, planes)
            blk["bn1"] = make_bn(nk(), planes)
            blk["conv2_w"] = make_conv(nk(), 3, 3, planes, planes)
            blk["bn2"] = make_bn(nk(), planes)
            blk["conv3_w"] = make_conv(nk(), 1, 1, planes, planes * 4)
            blk["bn3"] = make_bn(nk(), planes * 4)
            if s != 1 or inplanes != planes * 4:
                blk["down_w"] = make_conv(nk(), 1, 1, inplanes, planes * 4)
                blk["dbn"] = make_bn(nk(), planes * 4)
            else:
                blk["down_w"] = None
            blocks.append(blk)
            inplanes = planes * 4
        params["layers"].append(blocks)
    return params


# ---------------------------------------------------------------------------
# Forward pass (ResBase101.forward)
# ---------------------------------------------------------------------------
def bottleneck(x, blk):
    out = conv_bn(x, blk["conv1_w"], blk["bn1"], stride=1, padding=0, relu=True)
    out = conv_bn(out, blk["conv2_w"], blk["bn2"], stride=blk["stride"],
                  padding=1, relu=True)
    if blk["down_w"] is not None:
        identity = conv_bn(x, blk["down_w"], blk["dbn"], stride=blk["stride"],
                           padding=0, relu=False)
    else:
        identity = x
    # conv3 + bn3 + residual add + relu, fused in one Pallas kernel
    out = conv_bn(out, blk["conv3_w"], blk["bn3"], stride=1, padding=0,
                  relu=True, residual=identity)
    return out


def resbase101_forward(x_nchw, params):
    # NCHW (PyTorch) -> NHWC once; all Pallas compute is channels-last bf16.
    x = jnp.transpose(x_nchw, (0, 2, 3, 1)).astype(jnp.bfloat16)
    x = conv_bn(x, params["conv1"], params["bn1"], stride=2, padding=3,
                relu=True)                       # conv1 + bn1 + relu
    x = maxpool_3x3_s2(x)                        # maxpool
    for layer in params["layers"]:               # layer1..layer4
        for blk in layer:
            x = bottleneck(x, blk)
    feat = global_avgpool(x)                     # avgpool + view(B, -1)
    return feat                                  # [B, 2048] f32


if __name__ == "__main__":
    key = jax.random.PRNGKey(0)
    pkey, xkey = jax.random.split(key)
    params = build_params(pkey)
    # small input consistent with an image backbone (NCHW, 3 channels)
    x = jax.random.normal(xkey, (2, 3, 16, 16), jnp.float32)

    feat = resbase101_forward(x, params)
    feat = jax.block_until_ready(feat)

    assert feat.shape == (2, 2048), feat.shape
    assert bool(jnp.all(jnp.isfinite(feat)))
    print("KERNEL_OK")
</pallas_src>

<mosaic_0001>
module attributes {stable_mosaic.version = 11 : i64} {
  func.func @_mm_bn_kernel(%arg0: i32, %arg1: i32, %arg2: i32, %arg3: memref<128x256xbf16, #tpu.memory_space<vmem>>, %arg4: memref<256x64xbf16, #tpu.memory_space<vmem>>, %arg5: memref<1x64xf32, #tpu.memory_space<vmem>>, %arg6: memref<1x64xf32, #tpu.memory_space<vmem>>, %arg7: memref<128x64xbf16, #tpu.memory_space<vmem>>, %arg8: memref<128x64xf32, #tpu.memory_space<vmem>>) attributes {dimension_semantics = [#tpu.dimension_semantics<parallel>, #tpu.dimension_semantics<parallel>, #tpu.dimension_semantics<arbitrary>], iteration_bounds = array<i64: 1, 1, 1>, scalar_prefetch = 0 : i64, scratch_operands = 1 : i64, tpu.core_type = #tpu.core_type<tc>, window_params = [{transform_indices = @transform_0, window_bounds = array<i64: 128, 256>}, {transform_indices = @transform_1, window_bounds = array<i64: 256, 64>}, {transform_indices = @transform_2, window_bounds = array<i64: 1, 64>}, {transform_indices = @transform_3, window_bounds = array<i64: 1, 64>}, {transform_indices = @transform_4, window_bounds = array<i64: 128, 64>}]} {
    %c0_i32 = arith.constant 0 : i32
    %0 = arith.cmpi eq, %arg2, %c0_i32 : i32
    %1 = arith.extui %0 : i1 to i32
    %c0_i32_0 = arith.constant 0 : i32
    %2 = arith.cmpi ne, %1, %c0_i32_0 : i32
    scf.if %2 {
      %cst_10 = arith.constant 0.000000e+00 : f32
      %12 = vector.broadcast %cst_10 : f32 to vector<128x64xf32>
      %c0_11 = arith.constant 0 : index
      %c0_12 = arith.constant 0 : index
      %13 = vector.load %arg8[%c0_11, %c0_12] : memref<128x64xf32, #tpu.memory_space<vmem>>, vector<128x64xf32>
      tpu.vector_store %arg8[%c0_11, %c0_12], %12 {strides = array<i32>} : memref<128x64xf32, #tpu.memory_space<vmem>>, vector<128x64xf32>,
    } else {
    }
    %c0 = arith.constant 0 : index
    %c0_1 = arith.constant 0 : index
    %3 = vector.load %arg8[%c0, %c0_1] : memref<128x64xf32, #tpu.memory_space<vmem>>, vector<128x64xf32>
    %c0_2 = arith.constant 0 : index
    %c0_3 = arith.constant 0 : index
    %4 = vector.load %arg3[%c0_2, %c0_3] : memref<128x256xbf16, #tpu.memory_space<vmem>>, vector<128x256xbf16>
    %c0_4 = arith.constant 0 : index
    %c0_5 = arith.constant 0 : index
    %5 = vector.load %arg4[%c0_4, %c0_5] : memref<256x64xbf16, #tpu.memory_space<vmem>>, vector<256x64xbf16>
    %cst = arith.constant dense<0.000000e+00> : vector<128x64xf32>
    %6 = tpu.matmul %4, %5, %cst {dimension_numbers = #tpu.dot_dimension_numbers<[1], [0], [0], [1], [0, 0, 1, 1], [], []>} : vector<128x256xbf16>, vector<256x64xbf16>, vector<128x64xf32> -> vector<128x64xf32>
    %7 = arith.addf %3, %6 : vector<128x64xf32>
    %c0_6 = arith.constant 0 : index
    %c0_7 = arith.constant 0 : index
    %8 = vector.load %arg8[%c0_6, %c0_7] : memref<128x64xf32, #tpu.memory_space<vmem>>, vector<128x64xf32>
    tpu.vector_store %arg8[%c0_6, %c0_7], %7 {strides = array<i32>} : memref<128x64xf32, #tpu.memory_space<vmem>>, vector<128x64xf32>,
    %c0_i32_8 = arith.constant 0 : i32
    %9 = arith.cmpi eq, %arg2, %c0_i32_8 : i32
    %10 = arith.extui %9 : i1 to i32
    %c0_i32_9 = arith.constant 0 : i32
    %11 = arith.cmpi ne, %10, %c0_i32_9 : i32
    scf.if %11 {
      %c0_10 = arith.constant 0 : index
      %c0_11 = arith.constant 0 : index
      %12 = vector.load %arg8[%c0_10, %c0_11] : memref<128x64xf32, #tpu.memory_space<vmem>>, vector<128x64xf32>
      %c0_12 = arith.constant 0 : index
      %c0_13 = arith.constant 0 : index
      %13 = vector.load %arg5[%c0_12, %c0_13] : memref<1x64xf32, #tpu.memory_space<vmem>>, vector<1x64xf32>
      %14 = vector.broadcast %13 : vector<1x64xf32> to vector<128x64xf32>
      %15 = arith.mulf %12, %14 : vector<128x64xf32>
      %c0_14 = arith.constant 0 : index
      %c0_15 = arith.constant 0 : index
      %16 = vector.load %arg6[%c0_14, %c0_15] : memref<1x64xf32, #tpu.memory_space<vmem>>, vector<1x64xf32>
      %17 = vector.broadcast %16 : vector<1x64xf32> to vector<128x64xf32>
      %18 = arith.addf %15, %17 : vector<128x64xf32>
      %cst_16 = arith.constant 0.000000e+00 : f32
      %19 = vector.broadcast %cst_16 : f32 to vector<128x64xf32>
      %20 = arith.maximumf %18, %19 : vector<128x64xf32>
      %21 = arith.truncf %20 : vector<128x64xf32> to vector<128x64xbf16>
      %c0_17 = arith.constant 0 : index
      %c0_18 = arith.constant 0 : index
      %22 = vector.load %arg7[%c0_17, %c0_18] : memref<128x64xbf16, #tpu.memory_space<vmem>>, vector<128x64xbf16>
      tpu.vector_store %arg7[%c0_17, %c0_18], %21 {strides = array<i32>} : memref<128x64xbf16, #tpu.memory_space<vmem>>, vector<128x64xbf16>,
    } else {
    }
    return
  }
  func.func @transform_0(%arg0: i32, %arg1: i32, %arg2: i32) -> (i32, i32) {
    %c0_i32 = arith.constant 0 : i32
    return %arg0, %arg2 : i32, i32
  }
  func.func @transform_1(%arg0: i32, %arg1: i32, %arg2: i32) -> (i32, i32) {
    %c0_i32 = arith.constant 0 : i32
    return %arg2, %arg1 : i32, i32
  }
  func.func @transform_2(%arg0: i32, %arg1: i32, %arg2: i32) -> (i32, i32) {
    %c0_i32 = arith.constant 0 : i32
    %c0_i32_0 = arith.constant 0 : i32
    return %c0_i32, %arg1 : i32, i32
  }
  func.func @transform_3(%arg0: i32, %arg1: i32, %arg2: i32) -> (i32, i32) {
    %c0_i32 = arith.constant 0 : i32
    %c0_i32_0 = arith.constant 0 : i32
    return %c0_i32, %arg1 : i32, i32
  }
  func.func @transform_4(%arg0: i32, %arg1: i32, %arg2: i32) -> (i32, i32) {
    %c0_i32 = arith.constant 0 : i32
    return %arg0, %arg1 : i32, i32
  }
}

</mosaic_0001>

<bundles_post_ra>
// kernel: tpu_custom_call.1
= control target key start
LH: loop header
LB: loop body
LE: loop exit
PB: predicated region body
PF: predicated region fallthrough
CT: control target
= control target key end

     0   :  { %vm21_vm0 = vcmask 523264   ;;  %vm500_vm1 = vcmask 519168   ;;  %s1008_s1 = inlined_call_operand.vmem [shape: bf16[256,64], index: 1, kind: input, shape index: {}]   ;;  %s1009_s0 = inlined_call_operand.vmem [shape: bf16[128,256], index: 0, kind: input, shape index: {}]   ;;  %s1010_s2 = inlined_call_operand.vmem [shape: f32[1,64], index: 2, kind: input, shape index: {}]   ;;  %s1011_s3 = inlined_call_operand.vmem [shape: f32[1,64], index: 3, kind: input, shape index: {}]   ;;  %s1012_s4 = inlined_call_operand.vmem [shape: bf16[128,64], index: 4, kind: output, shape index: {}]  }
   0x1   :  { %v672_v0 = vld [vmem:[%s1008_s1 + $0x38] sm:$0xff]  ;;  %v671_v2 = vld [vmem:[%s1008_s1 + $0x30] sm:$0xff]  ;;  %v670_v4 = vld [vmem:[%s1008_s1 + $0x28] sm:$0xff] }
   0x2   :  { %v680_v1 = vld [vmem:[%s1008_s1 + $0x78] sm:$0xff]  ;;  %278 = vmatpush.bf16.msra.mxu0 %v672_v0  ;;  %681 = vmatpush.bf16.msra.mxu2 %v672_v0  ;;  %v679_v3 = vld [vmem:[%s1008_s1 + $0x70] sm:$0xff]  ;;  %v678_v5 = vld [vmem:[%s1008_s1 + $0x68] sm:$0xff]  ;;  %v700_v0 = vmov 0.0  }
   0x3   :  { %327 = vmatpush.bf16.msra.mxu1 %v680_v1  ;;  %689 = vmatpush.bf16.msra.mxu3 %v680_v1  ;;  %v669_v6 = vld [vmem:[%s1008_s1 + $0x20] sm:$0xff]  ;;  %v668_v8 = vld [vmem:[%s1008_s1 + $0x18] sm:$0xff]  ;;  %v667_v10 = vld [vmem:[%s1008_s1 + $0x10] sm:$0xff]  ;;  %22 = vst.msk [vmem:[#allocation2] sm:$0xff] %vm21_vm0, %v700_v0 }
   0x4   :  { %v677_v7 = vld [vmem:[%s1008_s1 + $0x60] sm:$0xff]  ;;  %v676_v9 = vld [vmem:[%s1008_s1 + $0x58] sm:$0xff]  ;;  %v675_v11 = vld [vmem:[%s1008_s1 + $0x50] sm:$0xff]  ;;  %23 = vst.msk [vmem:[#allocation2 + $0x8] sm:$0xff] %vm21_vm0, %v700_v0 }
   0x5   :  { %v666_v12 = vld [vmem:[%s1008_s1 + $0x8] sm:$0xff]  ;;  %v665_v14 = vld [vmem:[%s1008_s1] sm:$0xff]  ;;  %v531_v28 = vld [vmem:[%s1009_s0 + $0x10] sm:$0xf]  ;;  %24 = vst.msk [vmem:[#allocation2 + $0x10] sm:$0xff] %vm21_vm0, %v700_v0 }
   0x6   :  { %279 = vmatpush.bf16.msra.mxu0 %v671_v2  ;;  %682 = vmatpush.bf16.msra.mxu2 %v671_v2  ;;  %v674_v13 = vld [vmem:[%s1008_s1 + $0x48] sm:$0xff]  ;;  %v673_v15 = vld [vmem:[%s1008_s1 + $0x40] sm:$0xff]  ;;  %v652_v29 = vld [vmem:[%s1009_s0 + $0x14] sm:$0xf0]  ;;  %25 = vst.msk [vmem:[#allocation2 + $0x18] sm:$0xff] %vm21_vm0, %v700_v0 }
   0x7   :  { %328 = vmatpush.bf16.msra.mxu1 %v679_v3  ;;  %690 = vmatpush.bf16.msra.mxu3 %v679_v3  ;;  %v523_v16 = vld [vmem:[%s1009_s0] sm:$0xf]  ;;  %v650_v17 = vld [vmem:[%s1009_s0 + $0x4] sm:$0xf0]  ;;  %v649_v20 = vld [vmem:[%s1009_s0 + $0x4] sm:$0xf]  ;;  %v532_v36 = vor.u32 %v652_v29, %v531_v28 }
   0x8   :  { %v555_v18 = vld [vmem:[%s1009_s0 + $0x40] sm:$0xf]  ;;  %v658_v19 = vld [vmem:[%s1009_s0 + $0x44] sm:$0xf0]  ;;  %v525_v21 = vld [vmem:[%s1009_s0 + $0x8] sm:$0xf0]  ;;  %v524_v24 = vor.u32 %v650_v17, %v523_v16 }
   0x9   :  { %v657_v22 = vld [vmem:[%s1009_s0 + $0x44] sm:$0xf]  ;;  %v557_v23 = vld [vmem:[%s1009_s0 + $0x48] sm:$0xf0]  ;;  %v556_v25 = vor.u32 %v658_v19, %v555_v18  ;;  %v528_v26 = vor.u32 %v649_v20, %v525_v21  ;;  %v563_v30 = vld [vmem:[%s1009_s0 + $0x50] sm:$0xf] }
   0xa   :  { %280 = vmatpush.bf16.msra.mxu0 %v670_v4  ;;  %683 = vmatpush.bf16.msra.mxu2 %v670_v4  ;;  %v560_v27 = vor.u32 %v657_v22, %v557_v23  ;;  %v660_v31 = vld [vmem:[%s1009_s0 + $0x54] sm:$0xf0]  ;;  %v651_v32 = vld [vmem:[%s1009_s0 + $0x14] sm:$0xf]  ;;  %v533_v33 = vld [vmem:[%s1009_s0 + $0x18] sm:$0xf0] }
   0xb   :  { %329 = vmatpush.bf16.msra.mxu1 %v678_v5  ;;  %691 = vmatpush.bf16.msra.mxu3 %v678_v5  ;;  %v659_v34 = vld [vmem:[%s1009_s0 + $0x54] sm:$0xf]  ;;  %v565_v35 = vld [vmem:[%s1009_s0 + $0x58] sm:$0xf0]  ;;  %v564_v37 = vor.u32 %v660_v31, %v563_v30  ;;  %v536_v38 = vor.u32 %v651_v32, %v533_v33  ;;  %v539_v40 = vld [vmem:[%s1009_s0 + $0x20] sm:$0xf] }
   0xc   :  { %v568_v39 = vor.u32 %v659_v34, %v565_v35  ;;  %v654_v41 = vld [vmem:[%s1009_s0 + $0x24] sm:$0xf0]  ;;  %v571_v42 = vld [vmem:[%s1009_s0 + $0x60] sm:$0xf]  ;;  %v653_v44 = vld [vmem:[%s1009_s0 + $0x24] sm:$0xf] }
   0xd   :  { %v662_v43 = vld [vmem:[%s1009_s0 + $0x64] sm:$0xf0]  ;;  %v541_v45 = vld [vmem:[%s1009_s0 + $0x28] sm:$0xf0]  ;;  %v661_v46 = vld [vmem:[%s1009_s0 + $0x64] sm:$0xf]  ;;  %v540_v48 = vor.u32 %v654_v41, %v539_v40 }
   0xe   :  { %281 = vmatpush.bf16.msra.mxu0 %v669_v6  ;;  %684 = vmatpush.bf16.msra.mxu2 %v669_v6  ;;  %v573_v47 = vld [vmem:[%s1009_s0 + $0x68] sm:$0xf0]  ;;  %v572_v49 = vor.u32 %v662_v43, %v571_v42  ;;  %v544_v50 = vor.u32 %v653_v44, %v541_v45  ;;  %v547_v52 = vld [vmem:[%s1009_s0 + $0x30] sm:$0xf]  ;;  %v656_v53 = vld [vmem:[%s1009_s0 + $0x34] sm:$0xf0] }
   0xf   :  { %330 = vmatpush.bf16.msra.mxu1 %v677_v7  ;;  %692 = vmatpush.bf16.msra.mxu3 %v677_v7  ;;  %v576_v51 = vor.u32 %v661_v46, %v573_v47  ;;  %v579_v54 = vld [vmem:[%s1009_s0 + $0x70] sm:$0xf]  ;;  %v664_v55 = vld [vmem:[%s1009_s0 + $0x74] sm:$0xf0]  ;;  %v655_v56 = vld [vmem:[%s1009_s0 + $0x34] sm:$0xf]  ;;  %v548_v60 = vor.u32 %v656_v53, %v547_v52 }
  0x10   :  { %v549_v57 = vld [vmem:[%s1009_s0 + $0x38] sm:$0xf0]  ;;  %v663_v58 = vld [vmem:[%s1009_s0 + $0x74] sm:$0xf]  ;;  %v580_v61 = vor.u32 %v664_v55, %v579_v54  ;;  %26 = vst.msk [vmem:[#allocation2 + $0x20] sm:$0xff] %vm21_vm0, %v700_v0  ;;  %v38_v2 = vld [vmem:[#allocation2] sm:$0xff] }
  0x11   :  { %v581_v59 = vld [vmem:[%s1009_s0 + $0x78] sm:$0xf0]  ;;  %v552_v62 = vor.u32 %v655_v56, %v549_v57  ;;  %27 = vst.msk [vmem:[#allocation2 + $0x28] sm:$0xff] %vm21_vm0, %v700_v0  ;;  %v895_v16 = vld [vmem:[%s1011_s3] ss:$0 sm:$0xff] }
  0x12   :  { %282 = vmatpush.bf16.msra.mxu0 %v668_v8  ;;  %685 = vmatpush.bf16.msra.mxu2 %v668_v8  ;;  %v584_v63 = vor.u32 %v663_v58, %v581_v59  ;;  %28 = vst.msk [vmem:[#allocation2 + $0x30] sm:$0xff] %vm21_vm0, %v700_v0  ;;  %v41_v45 = vld [vmem:[#allocation2 + $0x18] sm:$0xff] }
  0x13   :  { %331 = vmatpush.bf16.msra.mxu1 %v676_v9  ;;  %693 = vmatpush.bf16.msra.mxu3 %v676_v9  ;;  %29 = vst.msk [vmem:[#allocation2 + $0x38] sm:$0xff] %vm21_vm0, %v700_v0 }
  0x14   :  { %30 = vst.msk [vmem:[#allocation2 + $0x40] sm:$0xff] %vm21_vm0, %v700_v0 }
  0x15   :  { %31 = vst.msk [vmem:[#allocation2 + $0x48] sm:$0xff] %vm21_vm0, %v700_v0 }
  0x16   :  { %283 = vmatpush.bf16.msra.mxu0 %v667_v10  ;;  %686 = vmatpush.bf16.msra.mxu2 %v667_v10  ;;  %32 = vst.msk [vmem:[#allocation2 + $0x50] sm:$0xff] %vm21_vm0, %v700_v0 }
  0x17   :  { %332 = vmatpush.bf16.msra.mxu1 %v675_v11  ;;  %694 = vmatpush.bf16.msra.mxu3 %v675_v11  ;;  %33 = vst.msk [vmem:[#allocation2 + $0x58] sm:$0xff] %vm21_vm0, %v700_v0  ;;  %v39_v11 = vld [vmem:[#allocation2 + $0x8] sm:$0xff] }
  0x18   :  { %34 = vst.msk [vmem:[#allocation2 + $0x60] sm:$0xff] %vm21_vm0, %v700_v0 }
  0x19   :  { %35 = vst.msk [vmem:[#allocation2 + $0x68] sm:$0xff] %vm21_vm0, %v700_v0 }
  0x1a   :  { %284 = vmatpush.bf16.msra.mxu0 %v666_v12  ;;  %687 = vmatpush.bf16.msra.mxu2 %v666_v12  ;;  %36 = vst.msk [vmem:[#allocation2 + $0x70] sm:$0xff] %vm21_vm0, %v700_v0 }
  0x1b   :  { %333 = vmatpush.bf16.msra.mxu1 %v674_v13  ;;  %695 = vmatpush.bf16.msra.mxu3 %v674_v13  ;;  %37 = vst.msk [vmem:[#allocation2 + $0x78] sm:$0xff] %vm21_vm0, %v700_v0  ;;  %v46_v7 = vld [vmem:[#allocation2 + $0x40] sm:$0xff] }
  0x1c   :  { %v890_v13 = vld [vmem:[%s1010_s2] ss:$0 sm:$0xff]  ;;  %v47_v21 = vld [vmem:[#allocation2 + $0x48] sm:$0xff] }
  0x1e   :  { %285 = vmatpush.bf16.msra.mxu0 %v665_v14  ;;  %688 = vmatpush.bf16.msra.mxu2 %v665_v14  ;;  %v49_v59 = vld [vmem:[#allocation2 + $0x58] sm:$0xff] }
  0x1f   :  { %334 = vmatpush.bf16.msra.mxu1 %v673_v15  ;;  %696 = vmatpush.bf16.msra.mxu3 %v673_v15 }
  0x21   :  { %286 = vmatmul.bf16.vlgmr.msra.gmra.mxu0 %v524_v24  ;;  %306 = vmatmul.bf16.vlgmr.msra.gmra.mxu2 %v556_v25 }
  0x22   :  { %335 = vmatmul.bf16.vlgmr.msra.gmra.mxu1 %v528_v26  ;;  %355 = vmatmul.bf16.vlgmr.msra.gmra.mxu3 %v560_v27  ;;  %v40_v26 = vld [vmem:[#allocation2 + $0x10] sm:$0xff] }
  0x31   :  { %291 = vmatmul.bf16.gmra.mxu0 %v532_v36  ;;  %311 = vmatmul.bf16.gmra.mxu2 %v564_v37 }
  0x32   :  { %340 = vmatmul.bf16.gmra.mxu1 %v536_v38  ;;  %360 = vmatmul.bf16.gmra.mxu3 %v568_v39  ;;  %v48_v39 = vld [vmem:[#allocation2 + $0x50] sm:$0xff] }
  0x41   :  { %296 = vmatmul.bf16.gmra.mxu0 %v540_v48  ;;  %316 = vmatmul.bf16.gmra.mxu2 %v572_v49 }
  0x42   :  { %345 = vmatmul.bf16.gmra.mxu1 %v544_v50  ;;  %365 = vmatmul.bf16.gmra.mxu3 %v576_v51 }
  0x51   :  { %301 = vmatmul.bf16.gmra.mxu0 %v548_v60  ;;  %321 = vmatmul.bf16.gmra.mxu2 %v580_v61 }
  0x52   :  { %350 = vmatmul.bf16.gmra.mxu1 %v552_v62  ;;  %370 = vmatmul.bf16.gmra.mxu3 %v584_v63 }
  0x9e   :  { %v287_v1 = vpop.f32.mrf.mxu0 }
  0x9f   :  { %v336_v3 = vpop.f32.mrf.mxu1 }
  0xa0   :  { %v337_v4 = vadd.f32 %v336_v3, %v287_v1  ;;  %v42_v1 = vld [vmem:[#allocation2 + $0x20] sm:$0xff] }
  0xa2   :  { %v376_v5 = vadd.f32 %v337_v4, %v38_v2 }
  0xa4   :  { %393 = vst.msk [vmem:[#allocation2] sm:$0xff] %vm21_vm0, %v376_v5  ;;  %v307_v6 = vpop.f32.mrf.mxu2 }
  0xa5   :  { %v356_v8 = vpop.f32.mrf.mxu3 }
  0xa6   :  { %v357_v9 = vadd.f32 %v356_v8, %v307_v6  ;;  %v289_v10 = vpop.f32.mrf.mxu0 }
  0xa7   :  { %v338_v12 = vpop.f32.mrf.mxu1 }
  0xa8   :  { %v384_v14 = vadd.f32 %v357_v9, %v46_v7  ;;  %v339_v15 = vadd.f32 %v338_v12, %v289_v10 }
  0xaa   :  { %401 = vst.msk [vmem:[#allocation2 + $0x40] sm:$0xff] %vm21_vm0, %v384_v14  ;;  %v377_v17 = vadd.f32 %v339_v15, %v39_v11 }
  0xab   :  { %v412_v18 = vld [vmem:[#allocation2] sm:$0xff] }
  0xac   :  { %v432_v19 = vmul.f32 %v890_v13, %v412_v18  ;;  %394 = vst.msk [vmem:[#allocation2 + $0x8] sm:$0xff] %vm21_vm0, %v377_v17  ;;  %v309_v20 = vpop.f32.mrf.mxu2  ;;  %v50_v17 = vld [vmem:[#allocation2 + $0x60] sm:$0xff] }
  0xad   :  { %v358_v22 = vpop.f32.mrf.mxu3 }
  0xae   :  { %v452_v23 = vadd.f32 %v895_v16, %v432_v19  ;;  %v359_v24 = vadd.f32 %v358_v22, %v309_v20  ;;  %v292_v25 = vpop.f32.mrf.mxu0 }
  0xaf   :  { %v341_v27 = vpop.f32.mrf.mxu1 }
  0xb0   :  { %v468_v28 = vmax.f32 %v452_v23, 0.0  ;;  %v385_v29 = vadd.f32 %v359_v24, %v47_v21  ;;  %v342_v30 = vadd.f32 %v341_v27, %v292_v25  ;;  %v43_v23 = vld [vmem:[#allocation2 + $0x28] sm:$0xff] }
  0xb1   :  { %v420_v31 = vld [vmem:[#allocation2 + $0x40] sm:$0xff] }
  0xb2   :  { %v484_v32 = vpack.c.bf16 %v468_v28, %v468_v28  ;;  %v440_v33 = vmul.f32 %v890_v13, %v420_v31  ;;  %402 = vst.msk [vmem:[#allocation2 + $0x48] sm:$0xff] %vm21_vm0, %v385_v29  ;;  %v378_v34 = vadd.f32 %v342_v30, %v40_v26 }
  0xb3   :  { %v413_v35 = vld [vmem:[#allocation2 + $0x8] sm:$0xff] }
  0xb4   :  { %501 = vst.msk [vmem:[%s1012_s4] sm:$0xf] %vm500_vm1, %v484_v32  ;;  %v460_v36 = vadd.f32 %v895_v16, %v440_v33  ;;  %v433_v37 = vmul.f32 %v890_v13, %v413_v35  ;;  %v312_v38 = vpop.f32.mrf.mxu2 }
  0xb5   :  { %395 = vst.msk [vmem:[#allocation2 + $0x10] sm:$0xff] %vm21_vm0, %v378_v34  ;;  %v361_v40 = vpop.f32.mrf.mxu3 }
  0xb6   :  { %v476_v41 = vmax.f32 %v460_v36, 0.0  ;;  %v453_v42 = vadd.f32 %v895_v16, %v433_v37  ;;  %v362_v43 = vadd.f32 %v361_v40, %v312_v38  ;;  %v294_v44 = vpop.f32.mrf.mxu0  ;;  %v51_v37 = vld [vmem:[#allocation2 + $0x68] sm:$0xff] }
  0xb7   :  { %v343_v46 = vpop.f32.mrf.mxu1 }
  0xb8   :  { %v492_v47 = vpack.c.bf16 %v476_v41, %v476_v41  ;;  %v469_v48 = vmax.f32 %v453_v42, 0.0  ;;  %v386_v49 = vadd.f32 %v362_v43, %v48_v39  ;;  %v344_v50 = vadd.f32 %v343_v46, %v294_v44  ;;  %v44_v43 = vld [vmem:[#allocation2 + $0x30] sm:$0xff] }
  0xb9   :  { %v421_v51 = vld [vmem:[#allocation2 + $0x48] sm:$0xff] }
  0xba   :  { %509 = vst.msk [vmem:[%s1012_s4 + $0x20] sm:$0xf] %vm500_vm1, %v492_v47  ;;  %v485_v52 = vpack.c.bf16 %v469_v48, %v469_v48  ;;  %v441_v53 = vmul.f32 %v890_v13, %v421_v51  ;;  %v379_v54 = vadd.f32 %v344_v50, %v41_v45 }
  0xbb   :  { %403 = vst.msk [vmem:[#allocation2 + $0x50] sm:$0xff] %vm21_vm0, %v386_v49 }
  0xbc   :  { %502 = vst.msk [vmem:[%s1012_s4 + $0x4] sm:$0xf] %vm500_vm1, %v485_v52  ;;  %v461_v55 = vadd.f32 %v895_v16, %v441_v53  ;;  %v414_v56 = vld [vmem:[#allocation2 + $0x10] sm:$0xff]  ;;  %v314_v57 = vpop.f32.mrf.mxu2 }
  0xbd   :  { %v434_v58 = vmul.f32 %v890_v13, %v414_v56  ;;  %396 = vst.msk [vmem:[#allocation2 + $0x18] sm:$0xff] %vm21_vm0, %v379_v54  ;;  %v363_v60 = vpop.f32.mrf.mxu3 }
  0xbe   :  { %v477_v61 = vmax.f32 %v461_v55, 0.0  ;;  %v364_v62 = vadd.f32 %v363_v60, %v314_v57  ;;  %v297_v63 = vpop.f32.mrf.mxu0  ;;  %v52_v57 = vld [vmem:[#allocation2 + $0x70] sm:$0xff] }
  0xbf   :  { %v454_v0 = vadd.f32 %v895_v16, %v434_v58  ;;  %v346_v2 = vpop.f32.mrf.mxu1 }
  0xc0   :  { %v493_v3 = vpack.c.bf16 %v477_v61, %v477_v61  ;;  %v387_v4 = vadd.f32 %v364_v62, %v49_v59  ;;  %v347_v5 = vadd.f32 %v346_v2, %v297_v63  ;;  %v45_v63 = vld [vmem:[#allocation2 + $0x38] sm:$0xff] }
  0xc1   :  { %v470_v6 = vmax.f32 %v454_v0, 0.0 }
  0xc2   :  { %510 = vst.msk [vmem:[%s1012_s4 + $0x24] sm:$0xf] %vm500_vm1, %v493_v3  ;;  %v422_v7 = vld [vmem:[#allocation2 + $0x50] sm:$0xff]  ;;  %v380_v8 = vadd.f32 %v347_v5, %v42_v1 }
  0xc3   :  { %v486_v9 = vpack.c.bf16 %v470_v6, %v470_v6  ;;  %v442_v10 = vmul.f32 %v890_v13, %v422_v7  ;;  %404 = vst.msk [vmem:[#allocation2 + $0x58] sm:$0xff] %vm21_vm0, %v387_v4 }
  0xc4   :  { %v415_v11 = vld [vmem:[#allocation2 + $0x18] sm:$0xff]  ;;  %397 = vst.msk [vmem:[#allocation2 + $0x20] sm:$0xff] %vm21_vm0, %v380_v8  ;;  %v317_v12 = vpop.f32.mrf.mxu2 }
  0xc5   :  { %503 = vst.msk [vmem:[%s1012_s4 + $0x8] sm:$0xf] %vm500_vm1, %v486_v9  ;;  %v462_v14 = vadd.f32 %v895_v16, %v442_v10  ;;  %v435_v15 = vmul.f32 %v890_v13, %v415_v11  ;;  %v366_v18 = vpop.f32.mrf.mxu3 }
  0xc6   :  { %v367_v19 = vadd.f32 %v366_v18, %v317_v12  ;;  %v299_v20 = vpop.f32.mrf.mxu0 }
  0xc7   :  { %v478_v21 = vmax.f32 %v462_v14, 0.0  ;;  %v455_v22 = vadd.f32 %v895_v16, %v435_v15  ;;  %v348_v24 = vpop.f32.mrf.mxu1  ;;  %v53_v14 = vld [vmem:[#allocation2 + $0x78] sm:$0xff] }
  0xc8   :  { %v388_v25 = vadd.f32 %v367_v19, %v50_v17  ;;  %v349_v26 = vadd.f32 %v348_v24, %v299_v20 }
  0xc9   :  { %v494_v27 = vpack.c.bf16 %v478_v21, %v478_v21  ;;  %v471_v28 = vmax.f32 %v455_v22, 0.0 }
  0xca   :  { %v423_v29 = vld [vmem:[#allocation2 + $0x58] sm:$0xff]  ;;  %405 = vst.msk [vmem:[#allocation2 + $0x60] sm:$0xff] %vm21_vm0, %v388_v25  ;;  %v381_v30 = vadd.f32 %v349_v26, %v43_v23 }
  0xcb   :  { %511 = vst.msk [vmem:[%s1012_s4 + $0x28] sm:$0xf] %vm500_vm1, %v494_v27  ;;  %v487_v31 = vpack.c.bf16 %v471_v28, %v471_v28  ;;  %v443_v32 = vmul.f32 %v890_v13, %v423_v29  ;;  %v416_v33 = vld [vmem:[#allocation2 + $0x20] sm:$0xff] }
  0xcc   :  { %v436_v34 = vmul.f32 %v890_v13, %v416_v33  ;;  %398 = vst.msk [vmem:[#allocation2 + $0x28] sm:$0xff] %vm21_vm0, %v381_v30  ;;  %v319_v35 = vpop.f32.mrf.mxu2 }
  0xcd   :  { %504 = vst.msk [vmem:[%s1012_s4 + $0xc] sm:$0xf] %vm500_vm1, %v487_v31  ;;  %v463_v36 = vadd.f32 %v895_v16, %v443_v32  ;;  %v368_v38 = vpop.f32.mrf.mxu3 }
  0xce   :  { %v456_v39 = vadd.f32 %v895_v16, %v436_v34  ;;  %v369_v40 = vadd.f32 %v368_v38, %v319_v35  ;;  %v302_v41 = vpop.f32.mrf.mxu0 }
  0xcf   :  { %v479_v42 = vmax.f32 %v463_v36, 0.0  ;;  %v351_v44 = vpop.f32.mrf.mxu1 }
  0xd0   :  { %v472_v45 = vmax.f32 %v456_v39, 0.0  ;;  %v389_v46 = vadd.f32 %v369_v40, %v51_v37  ;;  %v352_v47 = vadd.f32 %v351_v44, %v302_v41 }
  0xd1   :  { %v495_v48 = vpack.c.bf16 %v479_v42, %v479_v42  ;;  %v424_v49 = vld [vmem:[#allocation2 + $0x60] sm:$0xff] }
  0xd2   :  { %v488_v50 = vpack.c.bf16 %v472_v45, %v472_v45  ;;  %v444_v51 = vmul.f32 %v890_v13, %v424_v49  ;;  %406 = vst.msk [vmem:[#allocation2 + $0x68] sm:$0xff] %vm21_vm0, %v389_v46  ;;  %v382_v52 = vadd.f32 %v352_v47, %v44_v43 }
  0xd3   :  { %512 = vst.msk [vmem:[%s1012_s4 + $0x2c] sm:$0xf] %vm500_vm1, %v495_v48  ;;  %v417_v53 = vld [vmem:[#allocation2 + $0x28] sm:$0xff] }
  0xd4   :  { %505 = vst.msk [vmem:[%s1012_s4 + $0x10] sm:$0xf] %vm500_vm1, %v488_v50  ;;  %v464_v54 = vadd.f32 %v895_v16, %v444_v51  ;;  %v437_v55 = vmul.f32 %v890_v13, %v417_v53  ;;  %v322_v56 = vpop.f32.mrf.mxu2 }
  0xd5   :  { %399 = vst.msk [vmem:[#allocation2 + $0x30] sm:$0xff] %vm21_vm0, %v382_v52  ;;  %v371_v58 = vpop.f32.mrf.mxu3 }
  0xd6   :  { %v480_v59 = vmax.f32 %v464_v54, 0.0  ;;  %v457_v60 = vadd.f32 %v895_v16, %v437_v55  ;;  %v372_v61 = vadd.f32 %v371_v58, %v322_v56  ;;  %v304_v62 = vpop.f32.mrf.mxu0 }
  0xd7   :  { %v353_v0 = vpop.f32.mrf.mxu1 }
  0xd8   :  { %v496_v1 = vpack.c.bf16 %v480_v59, %v480_v59  ;;  %v473_v2 = vmax.f32 %v457_v60, 0.0  ;;  %v390_v3 = vadd.f32 %v372_v61, %v52_v57  ;;  %v354_v4 = vadd.f32 %v353_v0, %v304_v62 }
  0xd9   :  { %v425_v5 = vld [vmem:[#allocation2 + $0x68] sm:$0xff] }
  0xda   :  { %513 = vst.msk [vmem:[%s1012_s4 + $0x30] sm:$0xf] %vm500_vm1, %v496_v1  ;;  %v489_v6 = vpack.c.bf16 %v473_v2, %v473_v2  ;;  %v445_v7 = vmul.f32 %v890_v13, %v425_v5  ;;  %v383_v8 = vadd.f32 %v354_v4, %v45_v63 }
  0xdb   :  { %407 = vst.msk [vmem:[#allocation2 + $0x70] sm:$0xff] %vm21_vm0, %v390_v3 }
  0xdc   :  { %506 = vst.msk [vmem:[%s1012_s4 + $0x14] sm:$0xf] %vm500_vm1, %v489_v6  ;;  %v465_v9 = vadd.f32 %v895_v16, %v445_v7  ;;  %v418_v10 = vld [vmem:[#allocation2 + $0x30] sm:$0xff]  ;;  %v324_v11 = vpop.f32.mrf.mxu2 }
  0xdd   :  { %v438_v12 = vmul.f32 %v890_v13, %v418_v10  ;;  %400 = vst.msk [vmem:[#allocation2 + $0x38] sm:$0xff] %vm21_vm0, %v383_v8  ;;  %v373_v15 = vpop.f32.mrf.mxu3 }
  0xde   :  { %v481_v17 = vmax.f32 %v465_v9, 0.0  ;;  %v374_v18 = vadd.f32 %v373_v15, %v324_v11 }
  0xdf   :  { %v458_v19 = vadd.f32 %v895_v16, %v438_v12 }
  0xe0   :  { %v497_v20 = vpack.c.bf16 %v481_v17, %v481_v17  ;;  %v391_v21 = vadd.f32 %v374_v18, %v53_v14 }
  0xe1   :  { %v474_v22 = vmax.f32 %v458_v19, 0.0 }
  0xe2   :  { %514 = vst.msk [vmem:[%s1012_s4 + $0x34] sm:$0xf] %vm500_vm1, %v497_v20  ;;  %v426_v23 = vld [vmem:[#allocation2 + $0x70] sm:$0xff] }
  0xe3   :  { %v490_v24 = vpack.c.bf16 %v474_v22, %v474_v22  ;;  %v446_v25 = vmul.f32 %v890_v13, %v426_v23  ;;  %408 = vst.msk [vmem:[#allocation2 + $0x78] sm:$0xff] %vm21_vm0, %v391_v21 }
  0xe4   :  { %v419_v26 = vld [vmem:[#allocation2 + $0x38] sm:$0xff] }
  0xe5   :  { %507 = vst.msk [vmem:[%s1012_s4 + $0x18] sm:$0xf] %vm500_vm1, %v490_v24  ;;  %v466_v27 = vadd.f32 %v895_v16, %v446_v25  ;;  %v439_v28 = vmul.f32 %v890_v13, %v419_v26 }
  0xe7   :  { %v482_v29 = vmax.f32 %v466_v27, 0.0  ;;  %v459_v30 = vadd.f32 %v895_v16, %v439_v28 }
  0xe9   :  { %v498_v31 = vpack.c.bf16 %v482_v29, %v482_v29  ;;  %v475_v32 = vmax.f32 %v459_v30, 0.0 }
  0xea   :  { %v427_v33 = vld [vmem:[#allocation2 + $0x78] sm:$0xff] }
  0xeb   :  { %515 = vst.msk [vmem:[%s1012_s4 + $0x38] sm:$0xf] %vm500_vm1, %v498_v31  ;;  %v491_v34 = vpack.c.bf16 %v475_v32, %v475_v32  ;;  %v447_v35 = vmul.f32 %v890_v13, %v427_v33 }
  0xed   :  { %508 = vst.msk [vmem:[%s1012_s4 + $0x1c] sm:$0xf] %vm500_vm1, %v491_v34  ;;  %v467_v36 = vadd.f32 %v895_v16, %v447_v35 }
  0xef   :  { %v483_v37 = vmax.f32 %v467_v36, 0.0 }
  0xf1   :  { %v499_v38 = vpack.c.bf16 %v483_v37, %v483_v37 }
  0xf3   :  { %516 = vst.msk [vmem:[%s1012_s4 + $0x3c] sm:$0xf] %vm500_vm1, %v499_v38 }

</bundles_post_ra>
